<compile_context>
chip_gen: v6e
topology: v6e:2x2x1
jax: 0.10.0
libtpu: 0.0.40
codegen_flags: <defaults>
</compile_context>

<pallas_src>
import jax
import jax.numpy as jnp
from jax.experimental import pallas as pl
from jax.experimental.pallas import tpu as pltpu


def _drop_path_kernel(scale_ref, x_ref, o_ref):
    # scale_ref: (TN, 1)  f32 per-sample scale (0.0 or 1/keep_prob)
    # x_ref    : (TN, TF) tile of the flattened input
    # o_ref    : (TN, TF) output tile (same dtype as x)
    o_ref[...] = (x_ref[...] * scale_ref[...]).astype(o_ref.dtype)


def _choose_feature_tile(F, TN, itemsize, target_bytes=4 << 20):
    """Largest lane-dense feature tile with TN*TF*itemsize <= target_bytes."""
    max_tf = target_bytes // max(1, TN * itemsize)
    if F <= max_tf:
        return F  # full extent is always a legal block dim
    max_tf = max(128, (max_tf // 128) * 128)
    # Prefer a divisor of F that is a multiple of 128 (avoids masked stores
    # on remainder blocks).
    for tf in range(max_tf, 127, -128):
        if F % tf == 0:
            return tf
    # Fall back: remainder block handled by the cdiv grid (masked writeback).
    return max_tf


def drop_path_pallas(x, drop_prob: float = 0.0, training: bool = False, key=None):
    """Pallas implementation of drop_path(x, drop_prob, training)."""
    if drop_prob == 0.0 or not training:
        return x
    assert key is not None, "need an RNG key when training with drop_prob > 0"

    keep_prob = 1.0 - drop_prob
    orig_shape = x.shape
    N = x.shape[0]
    x_flat = x.reshape(N, -1)
    F = x_flat.shape[1]

    # Per-sample keep mask + rescale, computed once in float32 in the wrapper.
    # rand in [0,1)  =>  floor(keep_prob + rand) is 0 with prob drop_prob,
    # 1 with prob keep_prob -- identical semantics to the torch reference.
    rand = jax.random.uniform(key, (N, 1), dtype=jnp.float32)
    scale = jnp.floor(keep_prob + rand) * (1.0 / keep_prob)  # (N, 1) f32

    itemsize = jnp.dtype(x.dtype).itemsize
    # Batch tile: full N when small (always a legal block dim), otherwise a
    # 256-row tile (multiple of 8 sublanes); cdiv grid pads any remainder.
    TN = N if N <= 256 else 256
    TF = _choose_feature_tile(F, TN, itemsize)
    grid = (pl.cdiv(N, TN), pl.cdiv(F, TF))

    out_flat = pl.pallas_call(
        _drop_path_kernel,
        out_shape=jax.ShapeDtypeStruct((N, F), x.dtype),
        grid_spec=pltpu.PrefetchScalarGridSpec(
            num_scalar_prefetch=0,
            grid=grid,
            in_specs=[
                pl.BlockSpec((TN, 1), lambda i, j: (i, 0)),    # per-sample scale
                pl.BlockSpec((TN, TF), lambda i, j: (i, j)),   # x tile
            ],
            out_specs=pl.BlockSpec((TN, TF), lambda i, j: (i, j)),
        ),
        # x_flat is operand index 1 (after scale); reuse its HBM buffer for
        # the output of this purely elementwise op.
        input_output_aliases={1: 0},
        compiler_params=pltpu.CompilerParams(
            dimension_semantics=("parallel", "parallel"),
            vmem_limit_bytes=32 << 20,
        ),
    )(scale, x_flat)

    return out_flat.reshape(orig_shape)


def drop_path_ref(x, rand, drop_prob):
    """Pure-JAX reference mirroring the kernel math (same uniform draws)."""
    keep_prob = 1.0 - drop_prob
    scale = jnp.floor(keep_prob + rand) * (1.0 / keep_prob)   # (N, 1) f32
    scale = scale.reshape((x.shape[0],) + (1,) * (x.ndim - 1))
    return (x * scale).astype(x.dtype)


if __name__ == "__main__":
    key = jax.random.PRNGKey(0)
    k_x, k_mask = jax.random.split(key)

    # Small NCHW input consistent with typical DropPath usage.
    x = jax.random.normal(k_x, (2, 4, 16, 16), dtype=jnp.float32)
    drop_prob = 0.3

    # Inference / drop_prob==0 path: identity.
    y_eval = drop_path_pallas(x, drop_prob=drop_prob, training=False)
    assert jnp.array_equal(y_eval, x)
    y_zero = drop_path_pallas(x, drop_prob=0.0, training=True, key=k_mask)
    assert jnp.array_equal(y_zero, x)

    # Reference (computed before the kernel; uses the same uniform draws).
    rand = jax.random.uniform(k_mask, (x.shape[0], 1), dtype=jnp.float32)
    y_ref = drop_path_ref(x, rand, drop_prob)

    # Training path: run the Pallas kernel.
    y = drop_path_pallas(x, drop_prob=drop_prob, training=True, key=k_mask)
    y = jax.block_until_ready(y)

    assert y.shape == x.shape and y.dtype == x.dtype
    assert jnp.allclose(y, y_ref, atol=1e-6, rtol=1e-6)

    print("KERNEL_OK")
</pallas_src>

<mosaic_0001>
module attributes {stable_mosaic.version = 11 : i64} {
  func.func @_drop_path_kernel(%arg0: i32, %arg1: i32, %arg2: memref<2x1xf32, #tpu.memory_space<vmem>>, %arg3: memref<2x1024xf32, #tpu.memory_space<vmem>>, %arg4: memref<2x1024xf32, #tpu.memory_space<vmem>>) attributes {dimension_semantics = [#tpu.dimension_semantics<parallel>, #tpu.dimension_semantics<parallel>], iteration_bounds = array<i64: 1, 1>, scalar_prefetch = 0 : i64, scratch_operands = 0 : i64, tpu.core_type = #tpu.core_type<tc>, window_params = [{transform_indices = @transform_0, window_bounds = array<i64: 2, 1>}, {transform_indices = @transform_1, window_bounds = array<i64: 2, 1024>}, {transform_indices = @transform_2, window_bounds = array<i64: 2, 1024>}]} {
    %c0 = arith.constant 0 : index
    %c0_0 = arith.constant 0 : index
    %0 = vector.load %arg3[%c0, %c0_0] : memref<2x1024xf32, #tpu.memory_space<vmem>>, vector<2x1024xf32>
    %c0_1 = arith.constant 0 : index
    %c0_2 = arith.constant 0 : index
    %1 = vector.load %arg2[%c0_1, %c0_2] : memref<2x1xf32, #tpu.memory_space<vmem>>, vector<2x1xf32>
    %2 = vector.broadcast %1 : vector<2x1xf32> to vector<2x1024xf32>
    %3 = arith.mulf %0, %2 : vector<2x1024xf32>
    %c0_3 = arith.constant 0 : index
    %c0_4 = arith.constant 0 : index
    %4 = vector.load %arg4[%c0_3, %c0_4] : memref<2x1024xf32, #tpu.memory_space<vmem>>, vector<2x1024xf32>
    tpu.vector_store %arg4[%c0_3, %c0_4], %3 {strides = array<i32>} : memref<2x1024xf32, #tpu.memory_space<vmem>>, vector<2x1024xf32>,
    return
  }
  func.func @transform_0(%arg0: i32, %arg1: i32) -> (i32, i32) {
    %c0_i32 = arith.constant 0 : i32
    %c0_i32_0 = arith.constant 0 : i32
    return %arg0, %c0_i32 : i32, i32
  }
  func.func @transform_1(%arg0: i32, %arg1: i32) -> (i32, i32) {
    %c0_i32 = arith.constant 0 : i32
    return %arg0, %arg1 : i32, i32
  }
  func.func @transform_2(%arg0: i32, %arg1: i32) -> (i32, i32) {
    %c0_i32 = arith.constant 0 : i32
    return %arg0, %arg1 : i32, i32
  }
}

</mosaic_0001>

<bundles_post_ra>
// kernel: tpu_custom_call.1
= control target key start
LH: loop header
LB: loop body
LE: loop exit
PB: predicated region body
PF: predicated region fallthrough
CT: control target
= control target key end

     0   :  { %7 = vsyncpa [#allocation3], 0  ;;  %s135_s0 = inlined_call_operand.vmem [shape: f32[2,1], index: 0, kind: input, shape index: {}]   ;;  %s136_s1 = inlined_call_operand.hbm [shape: f32[2,1024], index: 1, kind: input, shape index: {}, may-alias: {1,2}]   ;;  %s137_s2 = inlined_call_operand.hbm [shape: f32[2,1024], index: 2, kind: output, shape index: {}, may-alias: {1,2}]  }
   0x1   :  { %8 = vsyncpa [#allocation4], 0  ;;  %s107_s9 = smov [#allocation2]  }
   0x2   :  { %s17_s10 = sshll.u32 %s107_s9, 4  ;;  %s18_s10 = int_to_ptr.vmem [resolvable:$true] %s17_s10 }
   0x3   :  { %s71_s11 = scalar_lea.vmem %s18_s10, 256  ;;  %p76_p1 = scmp.lt.s32.totalorder %s18_s10, %s18_s10 }
   0x4   :  { %p72_p0 = scmp.ne.s32.totalorder %s18_s10, %s71_s11  ;;  %p77_p2 = scmp.lt.s32.totalorder %s71_s11, %s71_s11 }
   0x6   :  { %p78_p3 = por %p77_p2, %p76_p1 }
   0x8   :  { %p79_p4 = pnand %p78_p3, %p72_p0 }
   0xa   :  { %82 = shalt.err (!%p79_p4)
}
   0xb   :  { %20 = dma.hbm_to_vmem [thread:$0]  %s136_s1, 256, %s18_s10, [#allocation3]  }
   0xc   :  { %103 = dma.done.wait [#allocation3], 256  }
   0xd   :  { %104 = vsyncadd [#allocation3], 4294967040  ;;  %v108_v0 = vmov 0   ;;  %v26_v1 = vld [vmem:[%s135_s0] sm:$0x3]  ;;  %v34_v4 = vlaneseq  ;;  %v25_v10 = vld [vmem:[#allocation2 + $0x8] sm:$0xff] }
   0xe   :  { %62 = vset.pattern.permute.xlu0 %v108_v0  ;;  %v109_v2 = vmov 269488144   ;;  %v24_v9 = vld [vmem:[#allocation2] sm:$0xff]  ;;  %s110_s16 = smov [#allocation5]  }
   0xf   :  { %29 = vperm.xlu0 %62, %v26_v1   ;;  %v32_v3 = vunpack.c.l.s4 %v109_v2  ;;  %v35_v6 = vshrl.u32 %v34_v4, 7  ;;  %s49_s1 = sshll.u32 %s110_s16, 4  ;;  %s50_s1 = int_to_ptr.vmem [resolvable:$true] %s49_s1 }
  0x10   :  { %s83_s17 = scalar_lea.vmem %s50_s1, 256  ;;  %p88_p6 = scmp.lt.s32.totalorder %s50_s1, %s50_s1 }
  0x11   :  { %v33_v5 = vunpack.c.0.s8 %v32_v3  ;;  %p84_p5 = scmp.ne.s32.totalorder %s50_s1, %s83_s17  ;;  %p89_p7 = scmp.lt.s32.totalorder %s83_s17, %s83_s17 }
  0x13   :  { %v36_v7 = vsub.s32 %v33_v5, %v35_v6  ;;  %p90_p8 = por %p89_p7, %p88_p6 }
  0x15   :  { %p91_p9 = pnand %p90_p8, %p84_p5 }
  0x8a   :  { %v30_v8 = vpop.permute.xlu0 %29 }
  0x8b   :  { %v37_v11 = vrot.slane %v30_v8, %v36_v7 }
  0x8d   :  { %v39_v12 = vmul.f32 %v37_v11, %v24_v9  ;;  %v40_v13 = vmul.f32 %v37_v11, %v25_v10 }
  0x8f   :  { %41 = vst [vmem:[#allocation5] sm:$0xff] %v39_v12  ;;  %42 = vst [vmem:[#allocation5 + $0x8] sm:$0xff] %v40_v13 }
  0x90   :  { %94 = shalt.err (!%p91_p9)
}
  0x91   :  { %52 = dma.vmem_to_hbm [thread:$0]  %s50_s1, 256, %s137_s2, [#allocation4]  }
  0x92   :  { %105 = dma.done.wait [#allocation4], 256  }
  0x93   :  { %106 = vsyncadd [#allocation4], 4294967040 }
  0x94   :  { %56 = vsyncpa [#allocation3], 1 }
  0x95   :  { %57 = vsyncpa [#allocation4], 1 }

</bundles_post_ra>
